<compile_context>
chip_gen: v7x
topology: tpu7x:2x2x1
jax: 0.10.0
libtpu: 0.0.40
codegen_flags: <defaults>
</compile_context>

<pallas_src>
import jax
import jax.numpy as jnp
from jax.experimental import pallas as pl
from jax.experimental.pallas import tpu as pltpu

_LANE_CANDIDATES = (1024, 512, 256, 128)   # lane widths that avoid any padding
_FALLBACK_LANE = 512                       # used only when padding is required
_TARGET_BLOCK_BYTES = 4 * 1024 * 1024      # ~4 MiB per (double-buffered) buffer
_MIN_SPLIT_BYTES = 256 * 1024              # only force >=2 grid steps above this
_VMEM_LIMIT_BYTES = 32 * 1024 * 1024       # safe on v5e/v6e/v7x


def _h_sigmoid_kernel(x_ref, o_ref):
    x = x_ref[...]
    # ReLU6(x + 3) / 6  (weak-typed constants keep bf16 inputs in bf16)
    o_ref[...] = (jnp.clip(x + 3.0, 0.0, 6.0) / 6.0).astype(o_ref.dtype)


def _round_up(n: int, m: int) -> int:
    return ((n + m - 1) // m) * m


def h_sigmoid(x: jax.Array) -> jax.Array:
    """Elementwise hard-sigmoid matching the torch h_sigmoid forward.

    Elementwise, so any input shape/layout (NCHW in the reference module) is
    flattened to a lane-dense 2-D slab, processed, and reshaped back.
    """
    orig_shape = x.shape
    total = int(x.size)
    if total == 0:
        return x

    itemsize = x.dtype.itemsize

    # Lane width: largest candidate dividing total -> no pad / no slice pass.
    lane = next((c for c in _LANE_CANDIDATES if total % c == 0), None)
    needs_pad = lane is None
    if needs_pad:
        lane = _FALLBACK_LANE

    flat = x.reshape(-1)
    padded_total = _round_up(total, lane)
    if needs_pad and padded_total != total:
        flat = jnp.pad(flat, (0, padded_total - total))
    rows = padded_total // lane
    x2d = flat.reshape(rows, lane)

    # Row-tile sizing (dtype-aware so per-step byte volume stays ~constant).
    pack = max(8, 32 // itemsize)            # sublane packing: f32=8, bf16=16
    row_bytes = lane * itemsize
    target_rows = max(pack, (_TARGET_BLOCK_BYTES // row_bytes) // pack * pack)
    slab_bytes = rows * row_bytes

    if rows < 2 * pack or slab_bytes <= _MIN_SPLIT_BYTES:
        # Small slab: one block equal to the full array dims (always legal).
        tr = rows
    else:
        # At least 2 grid steps (v7x megacore), each a multiple of `pack` rows.
        half = _round_up(-(-rows // 2), pack)
        tr = min(target_rows, half)

    grid = (pl.cdiv(rows, tr),)

    out2d = pl.pallas_call(
        _h_sigmoid_kernel,
        out_shape=jax.ShapeDtypeStruct((rows, lane), x.dtype),
        grid=grid,
        in_specs=[pl.BlockSpec((tr, lane), lambda i: (i, 0))],
        out_specs=pl.BlockSpec((tr, lane), lambda i: (i, 0)),
        compiler_params=pltpu.CompilerParams(
            dimension_semantics=("parallel",),
            vmem_limit_bytes=_VMEM_LIMIT_BYTES,
        ),
        cost_estimate=pl.CostEstimate(
            flops=4 * total,
            transcendentals=0,
            bytes_accessed=2 * total * itemsize,
        ),
    )(x2d)

    out_flat = out2d.reshape(-1)
    if needs_pad and padded_total != total:
        out_flat = out_flat[:total]
    return out_flat.reshape(orig_shape)


if __name__ == "__main__":
    key = jax.random.PRNGKey(0)
    # NCHW input, small shapes: batch=2, channels=4, spatial=16x16
    x = jax.random.normal(key, (2, 4, 16, 16), dtype=jnp.float32) * 4.0

    y = jax.block_until_ready(h_sigmoid(x))

    # Reference check against plain JAX (exact PyTorch formula).
    ref = jnp.clip(x + 3.0, 0.0, 6.0) / 6.0
    assert y.shape == x.shape and y.dtype == x.dtype
    assert float(jnp.max(jnp.abs(y - ref))) < 1e-6

    print("KERNEL_OK")
</pallas_src>

<mosaic_0001>
module attributes {stable_mosaic.version = 11 : i64} {
  func.func @_h_sigmoid_kernel(%arg0: i32, %arg1: memref<2x1024xf32, #tpu.memory_space<vmem>>, %arg2: memref<2x1024xf32, #tpu.memory_space<vmem>>) attributes {dimension_semantics = [#tpu.dimension_semantics<parallel>], iteration_bounds = array<i64: 1>, scalar_prefetch = 0 : i64, scratch_operands = 0 : i64, tpu.core_type = #tpu.core_type<tc>, window_params = [{transform_indices = @transform_0, window_bounds = array<i64: 2, 1024>}, {transform_indices = @transform_1, window_bounds = array<i64: 2, 1024>}]} {
    %c0 = arith.constant 0 : index
    %c0_0 = arith.constant 0 : index
    %0 = vector.load %arg1[%c0, %c0_0] : memref<2x1024xf32, #tpu.memory_space<vmem>>, vector<2x1024xf32>
    %cst = arith.constant 3.000000e+00 : f32
    %1 = vector.broadcast %cst : f32 to vector<2x1024xf32>
    %2 = arith.addf %0, %1 : vector<2x1024xf32>
    %cst_1 = arith.constant 0.000000e+00 : f32
    %cst_2 = arith.constant 6.000000e+00 : f32
    %3 = vector.broadcast %cst_1 : f32 to vector<2x1024xf32>
    %4 = arith.maximumf %3, %2 : vector<2x1024xf32>
    %5 = vector.broadcast %cst_2 : f32 to vector<2x1024xf32>
    %6 = arith.minimumf %5, %4 : vector<2x1024xf32>
    %cst_3 = arith.constant 6.000000e+00 : f32
    %7 = vector.broadcast %cst_3 : f32 to vector<2x1024xf32>
    %8 = arith.divf %6, %7 : vector<2x1024xf32>
    %c0_4 = arith.constant 0 : index
    %c0_5 = arith.constant 0 : index
    %9 = vector.load %arg2[%c0_4, %c0_5] : memref<2x1024xf32, #tpu.memory_space<vmem>>, vector<2x1024xf32>
    tpu.vector_store %arg2[%c0_4, %c0_5], %8 {strides = array<i32>} : memref<2x1024xf32, #tpu.memory_space<vmem>>, vector<2x1024xf32>,
    return
  }
  func.func @transform_0(%arg0: i32) -> (i32, i32) {
    %c0_i32 = arith.constant 0 : i32
    %c0_i32_0 = arith.constant 0 : i32
    return %arg0, %c0_i32 : i32, i32
  }
  func.func @transform_1(%arg0: i32) -> (i32, i32) {
    %c0_i32 = arith.constant 0 : i32
    %c0_i32_0 = arith.constant 0 : i32
    return %arg0, %c0_i32 : i32, i32
  }
}

</mosaic_0001>

<bundles_post_ra>
// kernel: tpu_custom_call.1
= control target key start
LH: loop header
LB: loop body
LE: loop exit
PB: predicated region body
PF: predicated region fallthrough
CT: control target
= control target key end

     0   :  { %6 = vsyncpa [#allocation3], 0  ;;  %s135_s0 = inlined_call_operand.hbm [shape: f32[2,1024], index: 0, kind: input, shape index: {}]   ;;  %s136_s1 = inlined_call_operand.hbm [shape: f32[2,1024], index: 1, kind: output, shape index: {}]  }
   0x1   :  { %7 = vsyncpa [#allocation4], 0  ;;  %s99_s6 = smov [#allocation2]   ;;  %s51_s10 = scalar_lea.hbm %s135_s0, 256 }
   0x2   :  { %s14_s7 = sshll.u32 %s99_s6, 4  ;;  %p52_p0 = scmp.ne.s32.totalorder %s135_s0, %s51_s10  ;;  %s15_s7 = int_to_ptr.vmem [resolvable:$true] %s14_s7 }
   0x3   :  { %p55_p1 = scmp.lt.u32.totalorder %s51_s10, %s135_s0 }
   0x5   :  { %p57_p2 = pnand %p55_p1, %p52_p0 }
   0x7   :  { %60 = shalt.err (!%p57_p2)
}
   0x8   :  { %s61_s15 = scalar_lea.vmem %s15_s7, 256  ;;  %p66_p4 = scmp.lt.s32.totalorder %s15_s7, %s15_s7 }
   0x9   :  { %p62_p3 = scmp.ne.s32.totalorder %s15_s7, %s61_s15  ;;  %p67_p5 = scmp.lt.s32.totalorder %s61_s15, %s61_s15 }
   0xb   :  { %p68_p6 = por %p67_p5, %p66_p4 }
   0xd   :  { %p69_p7 = pnand %p68_p6, %p62_p3 }
   0xf   :  { %72 = shalt.err (!%p69_p7)
}
  0x10   :  { %17 = dma.hbm_to_vmem [thread:$0]  %s135_s0, 256, %s15_s7, [#allocation3]  }
  0x11   :  { %95 = dma.done.wait [#allocation3], 256  }
  0x12   :  { %96 = vsyncadd [#allocation3], 4294967040  ;;  %v21_v0 = vld [vmem:[#allocation2] sm:$0xff]  ;;  %v22_v1 = vld [vmem:[#allocation2 + $0x8] sm:$0xff]  ;;  %s100_s18 = smov [#allocation5]  }
  0x13   :  { %v23_v2 = vadd.f32 3.0, %v21_v0  ;;  %v24_v3 = vadd.f32 3.0, %v22_v1  ;;  %s40_s19 = sshll.u32 %s100_s18, 4  ;;  %s41_s19 = int_to_ptr.vmem [resolvable:$true] %s40_s19 }
  0x14   :  { %s73_s20 = scalar_lea.vmem %s41_s19, 256  ;;  %p78_p9 = scmp.lt.s32.totalorder %s41_s19, %s41_s19 }
  0x15   :  { %v25_v4 = vmax.f32 %v23_v2, 0.0  ;;  %v26_v5 = vmax.f32 %v24_v3, 0.0  ;;  %p74_p8 = scmp.ne.s32.totalorder %s41_s19, %s73_s20  ;;  %p79_p10 = scmp.lt.s32.totalorder %s73_s20, %s73_s20 }
  0x17   :  { %v27_v6 = vmin.f32 %v25_v4, 6.0  ;;  %v28_v7 = vmin.f32 %v26_v5, 6.0  ;;  %p80_p11 = por %p79_p10, %p78_p9 }
  0x19   :  { %v30_v8 = vmul.f32 0.16666667, %v27_v6  ;;  %v31_v9 = vmul.f32 0.16666667, %v28_v7  ;;  %p81_p12 = pnand %p80_p11, %p74_p8 }
  0x1b   :  { %32 = vst [vmem:[#allocation5] sm:$0xff] %v30_v8  ;;  %33 = vst [vmem:[#allocation5 + $0x8] sm:$0xff] %v31_v9 }
  0x1c   :  { %84 = shalt.err (!%p81_p12)
}
  0x1d   :  { %s85_s22 = scalar_lea.hbm %s136_s1, 256 }
  0x1e   :  { %p86_p13 = scmp.ne.s32.totalorder %s136_s1, %s85_s22  ;;  %p89_p0 = scmp.lt.u32.totalorder %s85_s22, %s136_s1 }
  0x20   :  { %p91_p1 = pnand %p89_p0, %p86_p13 }
  0x22   :  { %94 = shalt.err (!%p91_p1)
}
  0x23   :  { %43 = dma.vmem_to_hbm [thread:$0]  %s41_s19, 256, %s136_s1, [#allocation4]  }
  0x24   :  { %97 = dma.done.wait [#allocation4], 256  }
  0x25   :  { %98 = vsyncadd [#allocation4], 4294967040 }
  0x26   :  { %47 = vsyncpa [#allocation3], 1 }
  0x27   :  { %48 = vsyncpa [#allocation4], 1 }

</bundles_post_ra>
